<compile_context>
chip_gen: v7x
topology: tpu7x:2x2x1
jax: 0.10.0
libtpu: 0.0.40
codegen_flags: <defaults>
</compile_context>

<pallas_src>
import functools

import jax
import jax.numpy as jnp
from jax import lax
from jax.experimental import pallas as pl
from jax.experimental.pallas import tpu as pltpu


def _round_up(a, m):
    return -(-a // m) * m


def _conv_mean_kernel(x_ref, w_ref, b_ref, o_ref, *, C, L, H, W, batch_in_lanes):
    """Fused 3x3 conv (folded weights) + channel mean on a flattened layout.

    batch_in_lanes == False:
        x_ref: (TB, C*L) f32, o_ref: (TB, H*W) f32   (batch on sublanes)
    batch_in_lanes == True:
        x_ref: (C*L, TB) f32, o_ref: (H*W, TB) f32   (batch on lanes)
    w_ref: (C*9,) f32 in SMEM (folded weights [ic, ky, kx]); b_ref: (1,) f32 SMEM.
    """
    HW = H * W
    out_shape = o_ref.shape

    if batch_in_lanes:
        iota_shape, iota_dim = (HW, 1), 0

        def tap(start):
            # Sublane-addressed slice: plain VMEM address offset, no lane rotate.
            return x_ref[start:start + HW, :]
    else:
        iota_shape, iota_dim = (1, HW), 1

        def tap(start):
            return x_ref[:, start:start + HW]

    # 0/1 horizontal-halo masks, built on one row/column and broadcast ONCE.
    col = lax.broadcasted_iota(jnp.int32, iota_shape, iota_dim)
    col = (col & (W - 1)) if (W & (W - 1)) == 0 else (col % W)
    not_left = jnp.broadcast_to((col != 0).astype(jnp.float32), out_shape)
    not_right = jnp.broadcast_to((col != (W - 1)).astype(jnp.float32), out_shape)

    # Hoist the (<= 27) weight scalars out of the tap loops.
    w = [w_ref[i] for i in range(C * 9)]

    # Accumulate kx == 0 / 1 / 2 taps into separate partial sums; mask once per
    # side at the end (2 extra full-tile multiplies total instead of 6*C selects).
    acc_mid = jnp.full(out_shape, b_ref[0], dtype=jnp.float32)
    acc_left = jnp.zeros(out_shape, dtype=jnp.float32)
    acc_right = jnp.zeros(out_shape, dtype=jnp.float32)
    for ic in range(C):
        for ky in range(3):
            start = ic * L + ky * W
            wi = ic * 9 + ky * 3
            acc_left = acc_left + w[wi + 0] * tap(start + 0)
            acc_mid = acc_mid + w[wi + 1] * tap(start + 1)
            acc_right = acc_right + w[wi + 2] * tap(start + 2)

    o_ref[...] = acc_mid + not_left * acc_left + not_right * acc_right


def _input_block_spec(block_shape, index_map, multibuffer):
    # 3-deep input buffering to hide HBM->VMEM DMA behind the short per-step
    # compute once the grid has > 1 step; graceful fallback if this JAX version
    # does not expose pipeline_mode / Buffered.
    if multibuffer:
        try:
            return pl.BlockSpec(block_shape, index_map,
                                pipeline_mode=pl.Buffered(3))
        except Exception:
            pass
    return pl.BlockSpec(block_shape, index_map)


def dummy_model_forward(x, weight, bias):
    """x: (B, nc, H, W) with nc in {1, 3}; weight: (3, 3, 3, 3); bias: (3,)."""
    B, nc, H, W = x.shape
    assert nc in (1, 3), "torch expand(batch, 3, h, w) requires nc == 1 or 3"
    HW = H * W
    L = HW + 2 * (W + 1)          # per-channel flattened length (halo slop incl.)

    x = x.astype(jnp.float32)
    weight = weight.astype(jnp.float32)
    bias = bias.astype(jnp.float32)

    # Fold the mean over output channels into the weights (exact: linear op).
    w_mean = jnp.mean(weight, axis=0)               # (3, 3, 3)  [ic, ky, kx]
    b_eff = jnp.mean(bias).reshape(1)               # (1,)
    if nc == 1:
        # The 3 expanded input channels are identical copies -> also sum over ic.
        w_eff = jnp.sum(w_mean, axis=0)[None]       # (1, 3, 3)
        C = 1
    else:
        w_eff = w_mean                              # (3, 3, 3)
        C = 3
    w_flat = w_eff.reshape(-1)                      # (C*9,)

    # Single small pad: per image & channel -> [W+1 zeros, H*W pixels, W+1 zeros].
    xc = x[:, :C].reshape(B, C, HW)
    xf = jnp.pad(xc, ((0, 0), (0, 0), (W + 1, W + 1)))       # (B, C, L)

    # VMEM budgeting: ~3 input buffers + 2 output buffers per block, f32.
    bytes_per_image = (3 * C * L + 2 * HW) * 4
    VMEM_BUDGET = 8 * 1024 * 1024      # conservative across v5e / v6e / v7x

    # Transposed batch-in-lanes layout for large batches: tap slices become
    # sublane address offsets (no XLU lane rotations), lanes fully dense.
    batch_in_lanes = (B >= 256) and (128 * bytes_per_image <= VMEM_BUDGET)

    if batch_in_lanes:
        TB = 128
        Bp = _round_up(B, TB)                        # grid >= 2 since B >= 256
        x_work = jnp.transpose(xf, (1, 2, 0)).reshape(C * L, B)
        if Bp != B:
            x_work = jnp.pad(x_work, ((0, 0), (0, Bp - B)))
        in_block, in_map = (C * L, TB), (lambda b: (0, b))
        out_block, out_map = (HW, TB), (lambda b: (0, b))
        out_arr_shape = (HW, Bp)
    else:
        # Batch-in-sublanes layout.  TB: multiple of 8 (>= 8), capped at 128 and
        # by the VMEM budget, split so the grid has >= 2 steps when B allows.
        Bp8 = _round_up(B, 8)
        tb_budget = max(8, min(128, (VMEM_BUDGET // bytes_per_image) // 8 * 8))
        if Bp8 <= 8:
            TB = 8
        elif Bp8 <= 2 * tb_budget:
            TB = min(tb_budget, max(8, _round_up(-(-Bp8 // 2), 8)))
        else:
            TB = tb_budget
        Bp = _round_up(Bp8, TB)
        x_work = xf.reshape(B, C * L)
        if Bp != B:
            x_work = jnp.pad(x_work, ((0, Bp - B), (0, 0)))
        in_block, in_map = (TB, C * L), (lambda b: (b, 0))
        out_block, out_map = (TB, HW), (lambda b: (b, 0))
        out_arr_shape = (Bp, HW)

    num_steps = Bp // TB
    kernel = functools.partial(_conv_mean_kernel, C=C, L=L, H=H, W=W,
                               batch_in_lanes=batch_in_lanes)

    out_flat = pl.pallas_call(
        kernel,
        out_shape=jax.ShapeDtypeStruct(out_arr_shape, jnp.float32),
        grid_spec=pltpu.PrefetchScalarGridSpec(
            num_scalar_prefetch=0,
            grid=(num_steps,),
            in_specs=[
                _input_block_spec(in_block, in_map, multibuffer=num_steps > 1),
                pl.BlockSpec(memory_space=pltpu.MemorySpace.SMEM),
                pl.BlockSpec(memory_space=pltpu.MemorySpace.SMEM),
            ],
            out_specs=pl.BlockSpec(out_block, out_map),
        ),
        compiler_params=pltpu.CompilerParams(
            dimension_semantics=("parallel",),
            vmem_limit_bytes=32 * 1024 * 1024),
    )(x_work, w_flat, b_eff)

    if batch_in_lanes:
        out = jnp.transpose(out_flat[:, :B], (1, 0))
    else:
        out = out_flat[:B]
    return out.reshape(B, 1, H, W)


def _reference(x, weight, bias):
    # Pure-JAX reference of the original PyTorch forward (uncollapsed weights).
    B, nc, H, W = x.shape
    x3 = jnp.broadcast_to(x, (B, 3, H, W)).astype(jnp.float32)
    out = lax.conv_general_dilated(
        x3, weight.astype(jnp.float32),
        window_strides=(1, 1), padding=((1, 1), (1, 1)),
        dimension_numbers=("NCHW", "OIHW", "NCHW"))
    out = out + bias.astype(jnp.float32)[None, :, None, None]
    return jnp.mean(out, axis=1, keepdims=True)


def _init_params(key):
    # Deterministic synthetic Conv2d(3, 3, (3, 3)) parameters.
    kw, kb = jax.random.split(key)
    bound = 1.0 / (27.0 ** 0.5)
    weight = jax.random.uniform(kw, (3, 3, 3, 3), jnp.float32, -bound, bound)
    bias = jax.random.uniform(kb, (3,), jnp.float32, -bound, bound)
    return weight, bias


if __name__ == "__main__":
    key = jax.random.PRNGKey(0)
    k_x1, k_x2, k_p = jax.random.split(key, 3)
    weight, bias = _init_params(k_p)

    # Case 1: the module's intended use (nc=1, expanded to 3) — small batch,
    # batch-in-sublanes path.
    x1 = jax.random.normal(k_x1, (2, 1, 16, 16), jnp.float32)
    out1 = dummy_model_forward(x1, weight, bias)
    jax.block_until_ready(out1)
    assert out1.shape == (2, 1, 16, 16)
    ref1 = _reference(x1, weight, bias)
    assert jnp.allclose(out1, ref1, atol=1e-4, rtol=1e-4), float(
        jnp.max(jnp.abs(out1 - ref1)))

    # Case 2: nc=3, larger batch — exercises the transposed batch-in-lanes path
    # (no lane rotations), batch padding and the multi-step grid.
    x2 = jax.random.normal(k_x2, (260, 3, 16, 16), jnp.float32)
    out2 = dummy_model_forward(x2, weight, bias)
    jax.block_until_ready(out2)
    assert out2.shape == (260, 1, 16, 16)
    ref2 = _reference(x2, weight, bias)
    assert jnp.allclose(out2, ref2, atol=1e-4, rtol=1e-4), float(
        jnp.max(jnp.abs(out2 - ref2)))

    print("KERNEL_OK")
</pallas_src>

<mosaic_0001>
module attributes {stable_mosaic.version = 11 : i64} {
  func.func @_conv_mean_kernel(%arg0: i32, %arg1: memref<8x290xf32, #tpu.memory_space<vmem>>, %arg2: memref<9xf32, #tpu.memory_space<smem>>, %arg3: memref<1xf32, #tpu.memory_space<smem>>, %arg4: memref<8x256xf32, #tpu.memory_space<vmem>>) attributes {dimension_semantics = [#tpu.dimension_semantics<parallel>], iteration_bounds = array<i64: 1>, scalar_prefetch = 0 : i64, scratch_operands = 0 : i64, tpu.core_type = #tpu.core_type<tc>, window_params = [{transform_indices = @transform_0, window_bounds = array<i64: 8, 290>}, {transform_indices = @transform_1, window_bounds = array<i64: 9>}, {transform_indices = @transform_2, window_bounds = array<i64: 1>}, {transform_indices = @transform_3, window_bounds = array<i64: 8, 256>}]} {
    %0 = tpu.iota {dimensions = array<i32: 1>} : vector<1x256xi32>
    %c15_i32 = arith.constant 15 : i32
    %1 = vector.broadcast %c15_i32 : i32 to vector<1x256xi32>
    %2 = arith.andi %0, %1 : vector<1x256xi32>
    %c0_i32 = arith.constant 0 : i32
    %3 = vector.broadcast %c0_i32 : i32 to vector<1x256xi32>
    %4 = arith.cmpi ne, %2, %3 : vector<1x256xi32>
    %5 = arith.extui %4 : vector<1x256xi1> to vector<1x256xi32>
    %6 = arith.sitofp %5 : vector<1x256xi32> to vector<1x256xf32>
    %7 = vector.shape_cast %6 : vector<1x256xf32> to vector<1x256xf32>
    %8 = vector.broadcast %7 : vector<1x256xf32> to vector<8x256xf32>
    %c15_i32_0 = arith.constant 15 : i32
    %9 = vector.broadcast %c15_i32_0 : i32 to vector<1x256xi32>
    %10 = arith.cmpi ne, %2, %9 : vector<1x256xi32>
    %11 = arith.extui %10 : vector<1x256xi1> to vector<1x256xi32>
    %12 = arith.sitofp %11 : vector<1x256xi32> to vector<1x256xf32>
    %13 = vector.shape_cast %12 : vector<1x256xf32> to vector<1x256xf32>
    %14 = vector.broadcast %13 : vector<1x256xf32> to vector<8x256xf32>
    %c0 = arith.constant 0 : index
    %15 = memref.load %arg2[%c0] : memref<9xf32, #tpu.memory_space<smem>>
    %c1 = arith.constant 1 : index
    %16 = memref.load %arg2[%c1] : memref<9xf32, #tpu.memory_space<smem>>
    %c2 = arith.constant 2 : index
    %17 = memref.load %arg2[%c2] : memref<9xf32, #tpu.memory_space<smem>>
    %c3 = arith.constant 3 : index
    %18 = memref.load %arg2[%c3] : memref<9xf32, #tpu.memory_space<smem>>
    %c4 = arith.constant 4 : index
    %19 = memref.load %arg2[%c4] : memref<9xf32, #tpu.memory_space<smem>>
    %c5 = arith.constant 5 : index
    %20 = memref.load %arg2[%c5] : memref<9xf32, #tpu.memory_space<smem>>
    %c6 = arith.constant 6 : index
    %21 = memref.load %arg2[%c6] : memref<9xf32, #tpu.memory_space<smem>>
    %c7 = arith.constant 7 : index
    %22 = memref.load %arg2[%c7] : memref<9xf32, #tpu.memory_space<smem>>
    %c8 = arith.constant 8 : index
    %23 = memref.load %arg2[%c8] : memref<9xf32, #tpu.memory_space<smem>>
    %c0_1 = arith.constant 0 : index
    %24 = memref.load %arg3[%c0_1] : memref<1xf32, #tpu.memory_space<smem>>
    %25 = vector.broadcast %24 : f32 to vector<8x256xf32>
    %cst = arith.constant 0.000000e+00 : f32
    %26 = vector.broadcast %cst : f32 to vector<8x256xf32>
    %cst_2 = arith.constant 0.000000e+00 : f32
    %27 = vector.broadcast %cst_2 : f32 to vector<8x256xf32>
    %c0_3 = arith.constant 0 : index
    %c0_4 = arith.constant 0 : index
    %28 = vector.load %arg1[%c0_3, %c0_4] : memref<8x290xf32, #tpu.memory_space<vmem>>, vector<8x256xf32>
    %29 = vector.broadcast %15 : f32 to vector<8x256xf32>
    %30 = arith.mulf %29, %28 : vector<8x256xf32>
    %31 = arith.addf %26, %30 : vector<8x256xf32>
    %c0_5 = arith.constant 0 : index
    %c1_6 = arith.constant 1 : index
    %32 = vector.load %arg1[%c0_5, %c1_6] : memref<8x290xf32, #tpu.memory_space<vmem>>, vector<8x256xf32>
    %33 = vector.broadcast %16 : f32 to vector<8x256xf32>
    %34 = arith.mulf %33, %32 : vector<8x256xf32>
    %35 = arith.addf %25, %34 : vector<8x256xf32>
    %c0_7 = arith.constant 0 : index
    %c2_8 = arith.constant 2 : index
    %36 = vector.load %arg1[%c0_7, %c2_8] : memref<8x290xf32, #tpu.memory_space<vmem>>, vector<8x256xf32>
    %37 = vector.broadcast %17 : f32 to vector<8x256xf32>
    %38 = arith.mulf %37, %36 : vector<8x256xf32>
    %39 = arith.addf %27, %38 : vector<8x256xf32>
    %c0_9 = arith.constant 0 : index
    %c16 = arith.constant 16 : index
    %40 = vector.load %arg1[%c0_9, %c16] : memref<8x290xf32, #tpu.memory_space<vmem>>, vector<8x256xf32>
    %41 = vector.broadcast %18 : f32 to vector<8x256xf32>
    %42 = arith.mulf %41, %40 : vector<8x256xf32>
    %43 = arith.addf %31, %42 : vector<8x256xf32>
    %c0_10 = arith.constant 0 : index
    %c17 = arith.constant 17 : index
    %44 = vector.load %arg1[%c0_10, %c17] : memref<8x290xf32, #tpu.memory_space<vmem>>, vector<8x256xf32>
    %45 = vector.broadcast %19 : f32 to vector<8x256xf32>
    %46 = arith.mulf %45, %44 : vector<8x256xf32>
    %47 = arith.addf %35, %46 : vector<8x256xf32>
    %c0_11 = arith.constant 0 : index
    %c18 = arith.constant 18 : index
    %48 = vector.load %arg1[%c0_11, %c18] : memref<8x290xf32, #tpu.memory_space<vmem>>, vector<8x256xf32>
    %49 = vector.broadcast %20 : f32 to vector<8x256xf32>
    %50 = arith.mulf %49, %48 : vector<8x256xf32>
    %51 = arith.addf %39, %50 : vector<8x256xf32>
    %c0_12 = arith.constant 0 : index
    %c32 = arith.constant 32 : index
    %52 = vector.load %arg1[%c0_12, %c32] : memref<8x290xf32, #tpu.memory_space<vmem>>, vector<8x256xf32>
    %53 = vector.broadcast %21 : f32 to vector<8x256xf32>
    %54 = arith.mulf %53, %52 : vector<8x256xf32>
    %55 = arith.addf %43, %54 : vector<8x256xf32>
    %c0_13 = arith.constant 0 : index
    %c33 = arith.constant 33 : index
    %56 = vector.load %arg1[%c0_13, %c33] : memref<8x290xf32, #tpu.memory_space<vmem>>, vector<8x256xf32>
    %57 = vector.broadcast %22 : f32 to vector<8x256xf32>
    %58 = arith.mulf %57, %56 : vector<8x256xf32>
    %59 = arith.addf %47, %58 : vector<8x256xf32>
    %c0_14 = arith.constant 0 : index
    %c34 = arith.constant 34 : index
    %60 = vector.load %arg1[%c0_14, %c34] : memref<8x290xf32, #tpu.memory_space<vmem>>, vector<8x256xf32>
    %61 = vector.broadcast %23 : f32 to vector<8x256xf32>
    %62 = arith.mulf %61, %60 : vector<8x256xf32>
    %63 = arith.addf %51, %62 : vector<8x256xf32>
    %64 = arith.mulf %8, %55 : vector<8x256xf32>
    %65 = arith.addf %59, %64 : vector<8x256xf32>
    %66 = arith.mulf %14, %63 : vector<8x256xf32>
    %67 = arith.addf %65, %66 : vector<8x256xf32>
    %c0_15 = arith.constant 0 : index
    %c0_16 = arith.constant 0 : index
    %68 = vector.load %arg4[%c0_15, %c0_16] : memref<8x256xf32, #tpu.memory_space<vmem>>, vector<8x256xf32>
    tpu.vector_store %arg4[%c0_15, %c0_16], %67 {strides = array<i32>} : memref<8x256xf32, #tpu.memory_space<vmem>>, vector<8x256xf32>,
    return
  }
  func.func @transform_0(%arg0: i32) -> (i32, i32) {
    %c0_i32 = arith.constant 0 : i32
    %c0_i32_0 = arith.constant 0 : i32
    return %arg0, %c0_i32 : i32, i32
  }
  func.func @transform_1(%arg0: i32) -> i32 {
    %c0_i32 = arith.constant 0 : i32
    %c0_i32_0 = arith.constant 0 : i32
    return %c0_i32 : i32
  }
  func.func @transform_2(%arg0: i32) -> i32 {
    %c0_i32 = arith.constant 0 : i32
    %c0_i32_0 = arith.constant 0 : i32
    return %c0_i32 : i32
  }
  func.func @transform_3(%arg0: i32) -> (i32, i32) {
    %c0_i32 = arith.constant 0 : i32
    %c0_i32_0 = arith.constant 0 : i32
    return %arg0, %c0_i32 : i32, i32
  }
}

</mosaic_0001>

<bundles_post_ra>
// kernel: tpu_custom_call.1
= control target key start
LH: loop header
LB: loop body
LE: loop exit
PB: predicated region body
PF: predicated region fallthrough
CT: control target
= control target key end

     0   :  { %9 = vsyncpa [#allocation4], 0  ;;  %s499_s0 = inlined_call_operand.hbm [shape: f32[8,290], index: 0, kind: input, shape index: {}]   ;;  %s500_s1 = inlined_call_operand.vmem [shape: f32[9], index: 1, kind: input, shape index: {}]   ;;  %s501_s2 = inlined_call_operand.<no memory space> [shape: f32[1], index: 2, kind: input, shape index: {}]   ;;  %s502_s3 = inlined_call_operand.hbm [shape: f32[8,256], index: 3, kind: output, shape index: {}]  }
   0x1   :  { %10 = vsyncpa [#allocation6], 0 }
   0x2   :  { %11 = vsyncpa [#allocation5], 0  ;;  %s28_s14 = sshll.u32 %s500_s1, 4  ;;  %s375_s15 = smov [#allocation3]   ;;  %s29_s14 = int_to_ptr.vmem [resolvable:$true] %s28_s14 }
   0x3   :  { %s18_s16 = sshll.u32 %s375_s15, 4  ;;  %s313_s19 = scalar_lea.hbm %s499_s0, 384  ;;  %s19_s16 = int_to_ptr.vmem [resolvable:$true] %s18_s16 }
   0x4   :  { %p314_p0 = scmp.ne.s32.totalorder %s499_s0, %s313_s19  ;;  %p317_p1 = scmp.lt.u32.totalorder %s313_s19, %s499_s0 }
   0x6   :  { %p319_p2 = pnand %p317_p1, %p314_p0 }
   0x8   :  { %322 = shalt.err (!%p319_p2)
}
   0x9   :  { %s323_s24 = scalar_lea.vmem %s19_s16, 384  ;;  %p328_p4 = scmp.lt.s32.totalorder %s19_s16, %s19_s16 }
   0xa   :  { %p324_p3 = scmp.ne.s32.totalorder %s19_s16, %s323_s24  ;;  %p329_p5 = scmp.lt.s32.totalorder %s323_s24, %s323_s24 }
   0xc   :  { %p330_p6 = por %p329_p5, %p328_p4 }
   0xe   :  { %p331_p7 = pnand %p330_p6, %p324_p3 }
  0x10   :  { %334 = shalt.err (!%p331_p7)
}
  0x11   :  { %21 = dma.hbm_to_vmem [thread:$0]  %s499_s0, 384, %s19_s16, [#allocation4]  }
  0x12   :  { %s335_s26 = scalar_lea.vmem %s29_s14, 16  ;;  %p340_p9 = scmp.lt.s32.totalorder %s29_s14, %s29_s14 }
  0x13   :  { %p336_p8 = scmp.ne.s32.totalorder %s29_s14, %s335_s26  ;;  %p341_p10 = scmp.lt.s32.totalorder %s335_s26, %s335_s26 }
  0x15   :  { %p342_p11 = por %p341_p10, %p340_p9 }
  0x17   :  { %p343_p12 = pnand %p342_p11, %p336_p8 }
  0x19   :  { %346 = shalt.err (!%p343_p12)
}
  0x1a   :  { %s376_s27 = smov [#allocation7]  }
  0x1b   :  { %31 = dma.vmem_to_smem %s29_s14, 16, %s376_s27, [#allocation6]  }
  0x1c   :  { %369 = dma.done.wait [#allocation4], 384  }
  0x1d   :  { %370 = vsyncadd [#allocation4], 4294966912 }
  0x1e   :  { %371 = dma.done.wait [#allocation6], 16  }
  0x1f   :  { %372 = vsyncadd [#allocation6], 4294967280 }
  0x20   :  { %40 = sfence }
  0x21   :  { %s300_s28 = sld [smem:[#allocation7 + $0x5]]  ;;  %s303_s29 = sld [smem:[#allocation7 + $0x8]]  ;;  %v419_v0 = vld [vmem:[#allocation3 + $0x10] sm:$0xff]  ;;  %v421_v1 = vld [vmem:[#allocation3] sm:$0xff]  ;;  %v423_v3 = vld [vmem:[#allocation3 + $0x8] sm:$0xff]  ;;  %vm104_vm0 = vcmask 916480   ;;  %v41_v28 = vlaneseq }
  0x22   :  { %s298_s0 = sld [smem:[#allocation7 + $0x3]]  ;;  %s377_s30 = smov 112   ;;  %vm166_vm1 = vcmask 785408   ;;  %vm240_vm5 = vcmask 1031168   ;;  %vm223_vm7 = vcmask 7168   ;;  %vm269_vm8 = vcmask 1039360  }
  0x23   :  { %s301_s4 = sld [smem:[#allocation7 + $0x6]]  ;;  %s378_s5 = smov 96   ;;  %v42_v39 = vand.u32 127, %v41_v28 }
  0x24   :  { %s297_s6 = sld [smem:[#allocation7 + $0x2]]  ;;  %s299_s7 = sld [smem:[#allocation7 + $0x4]] }
  0x25   :  { %s449_s8 = sld [smem:[#allocation7]]  ;;  %s302_s9 = sld [smem:[#allocation7 + $0x7]]  ;;  %v44_v47 = vand.u32 15, %v42_v39  ;;  %v43_v48 = vadd.s32 128, %v42_v39 }
  0x26   :  { %s379_s10 = smov 126   ;;  %s381_s11 = smov 1  }
  0x27   :  { %v132_v2 = vstv %s300_s28  ;;  %v194_v6 = vstv %s303_s29  ;;  %vm46_vm2 = vcmp.ne.s32.totalorder %v44_v47, 0  ;;  %v45_v58 = vand.u32 15, %v43_v48  ;;  %s296_s12 = sld [smem:[#allocation7 + $0x1]]  ;;  %s383_s15 = smov [#allocation8]  }
  0x28   :  { %v135_v4 = vmul.f32 %v132_v2, %v419_v0  ;;  %v133_v5 = vmul.f32 %v132_v2, %v421_v1  ;;  %v195_v7 = vmul.f32 %v194_v6, %v421_v1  ;;  %v134_v8 = vmul.f32 %v132_v2, %v423_v3  ;;  %s282_s16 = sshll.u32 %s383_s15, 4  ;;  %s283_s16 = int_to_ptr.vmem [resolvable:$true] %s282_s16 }
  0x29   :  { %v197_v9 = vmul.f32 %v194_v6, %v419_v0  ;;  %v196_v10 = vmul.f32 %v194_v6, %v423_v3  ;;  %v91_v11 = vstv %s298_s0  ;;  %v153_v14 = vstv %s301_s4  ;;  %s347_s17 = scalar_lea.vmem %s283_s16, 256  ;;  %p352_p0 = scmp.lt.s32.totalorder %s283_s16, %s283_s16 }
  0x2a   :  { %143 = vrot.lane.b32.xlu1 %v135_v4, %s377_s30  ;;  %139 = vrot.lane.b32.xlu0 %v133_v5, %s377_s30  ;;  %v92_v12 = vmul.f32 %v91_v11, %v421_v1  ;;  %v93_v13 = vmul.f32 %v91_v11, %v423_v3  ;;  %v94_v15 = vmul.f32 %v91_v11, %v419_v0  ;;  %v84_v21 = vstv %s297_s6  ;;  %p348_p13 = scmp.ne.s32.totalorder %s283_s16, %s347_s17  ;;  %p353_p1 = scmp.lt.s32.totalorder %s347_s17, %s347_s17 }
  0x2b   :  { %v154_v16 = vmul.f32 %v153_v14, %v421_v1  ;;  %v155_v17 = vmul.f32 %v153_v14, %v423_v3  ;;  %v156_v18 = vmul.f32 %v153_v14, %v419_v0  ;;  %v85_v24 = vmul.f32 %v84_v21, %v421_v1 }
  0x2c   :  { %v86_v25 = vmul.f32 %v84_v21, %v423_v3  ;;  %v87_v29 = vmul.f32 %v84_v21, %v419_v0  ;;  %v111_v36 = vstv %s299_s7  ;;  %v71_v40 = vstv %s449_s8  ;;  %p354_p2 = por %p353_p1, %p352_p0 }
  0x2d   :  { %v112_v44 = vmul.f32 %v111_v36, %v421_v1  ;;  %v72_v46 = vmul.f32 %v71_v40, %v421_v1  ;;  %v113_v50 = vmul.f32 %v111_v36, %v423_v3  ;;  %v73_v52 = vmul.f32 %v71_v40, %v423_v3 }
  0x2e   :  { %201 = vrot.lane.b32.xlu1 %v195_v7, %s378_s5  ;;  %141 = vrot.lane.b32.xlu0 %v134_v8, %s377_s30  ;;  %v114_v54 = vmul.f32 %v111_v36, %v419_v0  ;;  %v173_v56 = vstv %s302_s9  ;;  %v380_v5 = vmov 0.0   ;;  %vm47_vm3 = vcmp.ne.s32.totalorder %v45_v58, 0  ;;  %p355_p3 = pnand %p354_p2, %p348_p13 }
  0x2f   :  { %v174_v60 = vmul.f32 %v173_v56, %v421_v1  ;;  %v175_v63 = vmul.f32 %v173_v56, %v423_v3  ;;  %v292_v6 = vsel %vm46_vm2, 1.0, %v380_v5  ;;  %v293_v11 = vsel %vm47_vm3, 1.0, %v380_v5 }
  0x30   :  { %vm52_vm4 = vcmp.ne.s32.totalorder %v44_v47, 15  ;;  %vm53_vm6 = vcmp.ne.s32.totalorder %v45_v58, 15 }
  0x32   :  { %205 = vrot.lane.b32.xlu1 %v197_v9, %s378_s5  ;;  %203 = vrot.lane.b32.xlu0 %v196_v10, %s378_s5  ;;  %v176_v9 = vmul.f32 %v173_v56, %v419_v0 }
  0x36   :  { %98 = vrot.lane.b32.xlu0 %v92_v12, %s377_s30  ;;  %100 = vrot.lane.b32.xlu1 %v93_v13, %s377_s30  ;;  %v294_v13 = vsel %vm52_vm4, 1.0, %v380_v5 }
  0x3a   :  { %102 = vrot.lane.b32.xlu0 %v94_v15, %s377_s30  ;;  %160 = vrot.lane.b32.xlu1 %v154_v16, %s378_s5 }
  0x3e   :  { %162 = vrot.lane.b32.xlu0 %v155_v17, %s378_s5  ;;  %164 = vrot.lane.b32.xlu1 %v156_v18, %s378_s5  ;;  %v295_v18 = vsel %vm53_vm6, 1.0, %v380_v5 }
  0x9c   :  { %v144_v19 = vpop.permute.xlu1 %143  ;;  %v140_v20 = vpop.permute.xlu0 %139 }
  0x9d   :  { %v152_v41 = vadd.f32 %v144_v19, %v87_v29 }
  0xa0   :  { %v202_v22 = vpop.permute.xlu1 %201  ;;  %v142_v23 = vpop.permute.xlu0 %141 }
  0xa1   :  { %v145_v26 = vsel %vm104_vm0, %v140_v20, %v142_v23  ;;  %v146_v27 = vsel %vm104_vm0, %v142_v23, %v144_v19 }
  0xa2   :  { %v150_v30 = vadd.f32 %v145_v26, %v85_v24  ;;  %v151_v31 = vadd.f32 %v146_v27, %v86_v25  ;;  %v77_v24 = vstv %s296_s12  ;;  %v68_v27 = vstv %s501_s2  ;;  %s382_s2 = smov 127  }
  0xa3   :  { %v78_v25 = vmul.f32 %v77_v24, %v421_v1 }
  0xa4   :  { %v206_v32 = vpop.permute.xlu1 %205  ;;  %v204_v33 = vpop.permute.xlu0 %203 }
  0xa5   :  { %v207_v34 = vsel %vm166_vm1, %v202_v22, %v204_v33  ;;  %v208_v35 = vsel %vm166_vm1, %v204_v33, %v206_v32  ;;  %v214_v45 = vadd.f32 %v206_v32, %v152_v41  ;;  %v81_v29 = vadd.f32 %v78_v25, %v68_v27 }
  0xa6   :  { %v212_v37 = vadd.f32 %v207_v34, %v150_v30  ;;  %v213_v38 = vadd.f32 %v208_v35, %v151_v31  ;;  %v80_v30 = vmul.f32 %v77_v24, %v419_v0  ;;  %v79_v32 = vmul.f32 %v77_v24, %v423_v3 }
  0xa8   :  { %236 = vrot.lane.b32.xlu1 %v213_v38, %s379_s10  ;;  %234 = vrot.lane.b32.xlu0 %v212_v37, %s379_s10  ;;  %v99_v42 = vpop.permute.xlu0 %98  ;;  %v101_v43 = vpop.permute.xlu1 %100  ;;  %v83_v35 = vadd.f32 %v80_v30, %v68_v27  ;;  %v82_v36 = vadd.f32 %v79_v32, %v68_v27 }
  0xa9   :  { %v105_v49 = vsel %vm104_vm0, %v99_v42, %v101_v43 }
  0xaa   :  { %v109_v57 = vadd.f32 %v105_v49, %v72_v46 }
  0xac   :  { %238 = vrot.lane.b32.xlu0 %v214_v45, %s379_s10  ;;  %118 = vrot.lane.b32.xlu1 %v112_v44, %s377_s30  ;;  %v103_v51 = vpop.permute.xlu0 %102  ;;  %v161_v53 = vpop.permute.xlu1 %160 }
  0xad   :  { %v106_v55 = vsel %vm104_vm0, %v101_v43, %v103_v51 }
  0xae   :  { %v110_v59 = vadd.f32 %v106_v55, %v73_v52 }
  0xb0   :  { %120 = vrot.lane.b32.xlu0 %v113_v50, %s377_s30  ;;  %122 = vrot.lane.b32.xlu1 %v114_v54, %s377_s30  ;;  %v163_v61 = vpop.permute.xlu0 %162  ;;  %v165_v62 = vpop.permute.xlu1 %164 }
  0xb1   :  { %v167_v2 = vsel %vm166_vm1, %v161_v53, %v163_v61  ;;  %v168_v4 = vsel %vm166_vm1, %v163_v61, %v165_v62 }
  0xb2   :  { %v171_v7 = vadd.f32 %v167_v2, %v109_v57  ;;  %v172_v8 = vadd.f32 %v168_v4, %v110_v59 }
  0xb4   :  { %180 = vrot.lane.b32.xlu0 %v174_v60, %s378_s5  ;;  %182 = vrot.lane.b32.xlu1 %v175_v63, %s378_s5  ;;  %v215_v10 = vmul.f32 %v292_v6, %v171_v7  ;;  %v216_v12 = vmul.f32 %v293_v11, %v172_v8 }
  0xb8   :  { %184 = vrot.lane.b32.xlu0 %v176_v9, %s378_s5  ;;  %219 = vrot.lane.b32.xlu1 %v215_v10, %s381_s11 }
  0xbc   :  { %221 = vrot.lane.b32.xlu0 %v216_v12, %s381_s11 }
 0x11a   :  { %v237_v14 = vpop.permute.xlu1 %236  ;;  %v235_v15 = vpop.permute.xlu0 %234 }
 0x11b   :  { %v241_v16 = vsel %vm240_vm5, %v235_v15, %v237_v14 }
 0x11c   :  { %v245_v17 = vmul.f32 %v294_v13, %v241_v16 }
 0x11e   :  { %v239_v19 = vpop.permute.xlu0 %238  ;;  %249 = vrot.lane.b32.xlu1 %v245_v17, %s381_s11  ;;  %v119_v22 = vpop.permute.xlu1 %118 }
 0x11f   :  { %v242_v20 = vsel %vm240_vm5, %v237_v14, %v239_v19 }
 0x120   :  { %v246_v21 = vmul.f32 %v295_v18, %v242_v20 }
 0x122   :  { %251 = vrot.lane.b32.xlu0 %v246_v21, %s381_s11  ;;  %v121_v23 = vpop.permute.xlu0 %120  ;;  %v123_v26 = vpop.permute.xlu1 %122 }
 0x123   :  { %v124_v31 = vsel %vm104_vm0, %v119_v22, %v121_v23  ;;  %v125_v38 = vsel %vm104_vm0, %v121_v23, %v123_v26  ;;  %v131_v39 = vadd.f32 %v123_v26, %v83_v35 }
 0x124   :  { %v129_v34 = vadd.f32 %v124_v31, %v81_v29  ;;  %v130_v41 = vadd.f32 %v125_v38, %v82_v36 }
 0x126   :  { %v181_v28 = vpop.permute.xlu0 %180  ;;  %v183_v33 = vpop.permute.xlu1 %182 }
 0x127   :  { %v186_v37 = vsel %vm166_vm1, %v181_v28, %v183_v33 }
 0x128   :  { %v191_v40 = vadd.f32 %v186_v37, %v129_v34 }
 0x12a   :  { %v185_v1 = vpop.permute.xlu0 %184  ;;  %v220_v42 = vpop.permute.xlu1 %219 }
 0x12b   :  { %v187_v43 = vsel %vm166_vm1, %v183_v33, %v185_v1  ;;  %v193_v44 = vadd.f32 %v185_v1, %v131_v39  ;;  %v228_v45 = vadd.f32 %v220_v42, %v191_v40 }
 0x12c   :  { %v192_v3 = vadd.f32 %v187_v43, %v130_v41 }
 0x12e   :  { %v222_v0 = vpop.permute.xlu0 %221 }
 0x12f   :  { %v224_v47 = vsel %vm223_vm7, %v220_v42, %v222_v0  ;;  %v230_v49 = vadd.f32 %v222_v0, %v193_v44 }
 0x130   :  { %v229_v50 = vadd.f32 %v224_v47, %v192_v3 }
 0x190   :  { %v250_v46 = vpop.permute.xlu1 %249 }
 0x191   :  { %v257_v48 = vadd.f32 %v250_v46, %v228_v45 }
 0x193   :  { %263 = vrot.lane.b32.xlu1 %v257_v48, %s382_s2 }
 0x194   :  { %v252_v51 = vpop.permute.xlu0 %251 }
 0x195   :  { %v253_v52 = vsel %vm223_vm7, %v250_v46, %v252_v51  ;;  %v259_v53 = vadd.f32 %v252_v51, %v230_v49 }
 0x196   :  { %v258_v54 = vadd.f32 %v253_v52, %v229_v50 }
 0x197   :  { %267 = vrot.lane.b32.xlu1 %v259_v53, %s382_s2 }
 0x198   :  { %265 = vrot.lane.b32.xlu0 %v258_v54, %s382_s2 }
 0x205   :  { %v264_v55 = vpop.permute.xlu1 %263 }
 0x209   :  { %v268_v56 = vpop.permute.xlu1 %267 }
 0x20a   :  { %v266_v57 = vpop.permute.xlu0 %265 }
 0x20b   :  { %v270_v58 = vsel %vm269_vm8, %v264_v55, %v266_v57  ;;  %v271_v59 = vsel %vm269_vm8, %v266_v57, %v268_v56 }
 0x20c   :  { %274 = vst [vmem:[#allocation8] sm:$0xff] %v270_v58  ;;  %275 = vst [vmem:[#allocation8 + $0x8] sm:$0xff] %v271_v59 }
 0x20d   :  { %358 = shalt.err (!%p355_p3)
}
 0x20e   :  { %s359_s20 = scalar_lea.hbm %s502_s3, 256 }
 0x20f   :  { %p360_p4 = scmp.ne.s32.totalorder %s502_s3, %s359_s20  ;;  %p363_p5 = scmp.lt.u32.totalorder %s359_s20, %s502_s3 }
 0x211   :  { %p365_p6 = pnand %p363_p5, %p360_p4 }
 0x213   :  { %368 = shalt.err (!%p365_p6)
}
 0x214   :  { %285 = dma.vmem_to_hbm [thread:$0]  %s283_s16, 256, %s502_s3, [#allocation5]  }
 0x215   :  { %373 = dma.done.wait [#allocation5], 256  }
 0x216   :  { %374 = vsyncadd [#allocation5], 4294967040 }
 0x217   :  { %289 = vsyncpa [#allocation4], 1 }
 0x218   :  { %290 = vsyncpa [#allocation5], 1 }
 0x219   :  { %291 = vsyncpa [#allocation6], 1 }

</bundles_post_ra>
